<compile_context>
chip_gen: v6e
topology: v6e:2x2x1
jax: 0.10.0
libtpu: 0.0.40
codegen_flags: <defaults>
</compile_context>

<pallas_src>
import jax
import jax.numpy as jnp
import numpy as np
from jax import lax
from jax.experimental import pallas as pl
from jax.experimental.pallas import tpu as pltpu


def _pick_windows_per_block(N, I, D, J, itemsize,
                            vmem_budget_bytes=12 * 1024 * 1024):
    """Largest divisor NT of N such that the double-buffered q/out blocks fit VMEM.

    Only tiles when the monolithic block would be large; when tiling, NT*I must be a
    multiple of 128 so the lane-dense out block stays (8,128)-legal.
    """
    R_total = N * I
    max_rows = vmem_budget_bytes // (2 * (D + J) * itemsize)   # double-buffered in+out
    max_rows = max(512, min(max_rows, 4096))
    if R_total <= max_rows:
        return N
    for nt in range(N, 0, -1):
        if N % nt:
            continue
        rt = nt * I
        if rt <= max_rows and rt % 128 == 0:
            return nt
    return N   # no legal tiling found; fall back to the monolithic block


def relative_positional_embedding(q, weights):
    """q: (B, H, N, I, D); weights: (J, H, D) (the nn.Parameter layout).
    Returns (B, H, N, I, J) == shift(einsum('bhnid,jhd->bhnij', q, w) * D**-0.5)."""
    B, H, N, I, D = q.shape
    J = weights.shape[0]
    R_total = N * I          # total matmul lanes per (b, h)
    L = I + J - 1            # width of the zero-extended score axis
    scale = D ** -0.5

    # ---- wrapper-side layout plumbing (cheap, one-off) ----------------------
    # heads-major weights, scale folded in (in f32, then cast: negligible rounding
    # difference vs. scaling after the matmul), J rows zero-padded to L rows so the
    # in-kernel matmul directly produces the right-zero-padded scores.
    w = (scale * weights.astype(jnp.float32)).astype(q.dtype)        # (J, H, D)
    w = jnp.transpose(w, (1, 0, 2))                                  # (H, J, D)
    w = jnp.pad(w, ((0, 0), (0, L - J), (0, 0)))                     # (H, L, D)
    # metadata-only reshape: fold the windows axis into the matmul lanes.
    q2 = q.reshape(B, H, R_total, D)

    NT = _pick_windows_per_block(N, I, D, J, q.dtype.itemsize)
    R_tile = NT * I
    num_rt = N // NT

    def kernel(q_ref, w_ref, o_ref):
        qb = q_ref[0, 0]                        # (R_tile, D)
        wb = w_ref[0]                           # (L, D) — only this head resident
        # hot path: single MXU dot per grid step, weights as LHS so the big R axis
        # lands on lanes; f32 accumulation.
        sT = lax.dot_general(
            wb, qb, (((1,), (1,)), ((), ())),
            preferred_element_type=jnp.float32)                      # (L, R_tile)

        # Relative-position shift, transposed layout:
        #   out_T[k, r] = sT[k + I - 1 - (r % I), r]  (zero when that row >= J, which
        #   lands in the zero-padded weight rows -> exact zeros, matching shift()).
        # Each R tile starts at a multiple of I, so the local lane index mod I equals
        # the global window position.  Exactly one mask is true per lane, so we seed
        # acc with the c == 0 slice and overwrite with selects (no adds).
        r_mod = lax.broadcasted_iota(jnp.int32, (1, R_tile), 1) % I
        acc = sT[0:J, :]                         # rows with r % I == I - 1
        for c in range(1, I):                    # rows with r % I == I - 1 - c
            acc = jnp.where(r_mod == (I - 1 - c), sT[c:c + J, :], acc)

        o_ref[0, 0] = acc.astype(o_ref.dtype)    # full-width lane-dense store

    flops = 2 * B * H * R_total * D * L
    bytes_accessed = (q2.size * q2.dtype.itemsize
                      + B * H * J * R_total * q.dtype.itemsize
                      + w.size * w.dtype.itemsize)

    out_t = pl.pallas_call(
        kernel,
        out_shape=jax.ShapeDtypeStruct((B, H, J, R_total), q.dtype),
        grid_spec=pltpu.PrefetchScalarGridSpec(
            num_scalar_prefetch=0,
            grid=(H, B, num_rt),                 # H outermost: weight block DMA'd H times
            in_specs=[
                pl.BlockSpec((1, 1, R_tile, D), lambda h, b, rt: (b, h, rt, 0)),
                pl.BlockSpec((1, L, D), lambda h, b, rt: (h, 0, 0)),
            ],
            out_specs=pl.BlockSpec((1, 1, J, R_tile), lambda h, b, rt: (b, h, 0, rt)),
        ),
        compiler_params=pltpu.CompilerParams(
            dimension_semantics=("parallel", "parallel", "parallel")),
        cost_estimate=pl.CostEstimate(flops=flops, transcendentals=0,
                                      bytes_accessed=bytes_accessed),
    )(q2, w)

    # A consumer that can take the (B, H, J, N*I) layout should skip this transpose.
    out = jnp.swapaxes(out_t, -1, -2)            # (B, H, R_total, J)
    return out.reshape(B, H, N, I, J)


# ---------- pure-JAX reference (mirrors the PyTorch module exactly) ----------
def _shift_ref(x):
    *lead, i, j = x.shape
    x = jnp.concatenate([x, jnp.zeros((*lead, i, i), x.dtype)], axis=-1)
    l = i + j - 1
    x = x.reshape(*lead, -1)
    pad = (-x.shape[-1]) % l
    x = jnp.concatenate([x, jnp.zeros((*lead, pad), x.dtype)], axis=-1)
    x = x.reshape(*lead, -1, l)
    return x[..., :i, i - 1:]


def _reference(q, weights):
    scale = q.shape[-1] ** -0.5
    emb = jnp.einsum('bhnid,jhd->bhnij', q, weights.astype(q.dtype),
                     precision=lax.Precision.HIGHEST) * scale
    return _shift_ref(emb)


if __name__ == "__main__":
    # module params: dim=D, heads=H, length=J ; q is (b, h, n, i, d)
    B, H, N, I, D = 2, 2, 2, 8, 32
    J = 8  # `length`

    key = jax.random.PRNGKey(0)
    kq, kw = jax.random.split(key)
    q = jax.random.normal(kq, (B, H, N, I, D), dtype=jnp.float32)
    # The module initializes `weights` to zeros; use deterministic non-zero values
    # here so the numerical check is meaningful.
    weights = 0.02 * jax.random.normal(kw, (J, H, D), dtype=jnp.float32)

    out = relative_positional_embedding(q, weights)
    out = jax.block_until_ready(out)

    ref = _reference(q, weights)
    np.testing.assert_allclose(np.asarray(out), np.asarray(ref), atol=1e-4, rtol=1e-3)
    print("KERNEL_OK")
</pallas_src>

<mosaic_0001>
module attributes {stable_mosaic.version = 11 : i64} {
  func.func @kernel(%arg0: i32, %arg1: i32, %arg2: i32, %arg3: memref<1x1x16x32xf32, #tpu.memory_space<vmem>>, %arg4: memref<1x15x32xf32, #tpu.memory_space<vmem>>, %arg5: memref<1x1x8x16xf32, #tpu.memory_space<vmem>>) attributes {dimension_semantics = [#tpu.dimension_semantics<parallel>, #tpu.dimension_semantics<parallel>, #tpu.dimension_semantics<parallel>], iteration_bounds = array<i64: 2, 2, 1>, scalar_prefetch = 0 : i64, scratch_operands = 0 : i64, tpu.core_type = #tpu.core_type<tc>, window_params = [{transform_indices = @transform_0, window_bounds = array<i64: 1, 1, 16, 32>}, {transform_indices = @transform_1, window_bounds = array<i64: 1, 15, 32>}, {transform_indices = @transform_2, window_bounds = array<i64: 1, 1, 8, 16>}]} {
    %c0 = arith.constant 0 : index
    %c0_0 = arith.constant 0 : index
    %c0_1 = arith.constant 0 : index
    %c0_2 = arith.constant 0 : index
    %0 = vector.load %arg3[%c0, %c0_0, %c0_1, %c0_2] : memref<1x1x16x32xf32, #tpu.memory_space<vmem>>, vector<1x1x16x32xf32>
    %1 = vector.shape_cast %0 : vector<1x1x16x32xf32> to vector<16x32xf32>
    %c0_3 = arith.constant 0 : index
    %c0_4 = arith.constant 0 : index
    %c0_5 = arith.constant 0 : index
    %2 = vector.load %arg4[%c0_3, %c0_4, %c0_5] : memref<1x15x32xf32, #tpu.memory_space<vmem>>, vector<1x15x32xf32>
    %3 = vector.shape_cast %2 : vector<1x15x32xf32> to vector<15x32xf32>
    %cst = arith.constant dense<0.000000e+00> : vector<15x16xf32>
    %4 = tpu.matmul %3, %1, %cst {dimension_numbers = #tpu.dot_dimension_numbers<[1], [1], [0], [0], [0, 0, 1, 0], [], []>} : vector<15x32xf32>, vector<16x32xf32>, vector<15x16xf32> -> vector<15x16xf32>
    %5 = tpu.iota {dimensions = array<i32: 1>} : vector<1x16xi32>
    %c8_i32 = arith.constant 8 : i32
    %c0_i32 = arith.constant 0 : i32
    %6 = arith.cmpi eq, %c8_i32, %c0_i32 : i32
    %c1_i32 = arith.constant 1 : i32
    %7 = arith.select %6, %c1_i32, %c8_i32 : i32
    %8 = vector.broadcast %7 : i32 to vector<1x16xi32>
    %9 = arith.remsi %5, %8 : vector<1x16xi32>
    %c0_i32_6 = arith.constant 0 : i32
    %10 = vector.broadcast %c0_i32_6 : i32 to vector<1x16xi32>
    %11 = arith.cmpi ne, %9, %10 : vector<1x16xi32>
    %c0_i32_7 = arith.constant 0 : i32
    %12 = vector.broadcast %c0_i32_7 : i32 to vector<1x16xi32>
    %13 = arith.cmpi slt, %9, %12 : vector<1x16xi32>
    %c0_i32_8 = arith.constant 0 : i32
    %14 = arith.cmpi slt, %7, %c0_i32_8 : i32
    %15 = vector.broadcast %14 : i1 to vector<1x16xi1>
    %16 = vector.broadcast %15 : vector<1x16xi1> to vector<1x16xi1>
    %17 = arith.xori %13, %16 : vector<1x16xi1>
    %18 = arith.andi %17, %11 : vector<1x16xi1>
    %19 = vector.broadcast %7 : i32 to vector<1x16xi32>
    %20 = arith.addi %9, %19 : vector<1x16xi32>
    %21 = arith.select %18, %20, %9 : vector<1x16xi1>, vector<1x16xi32>
    %22 = vector.extract_strided_slice %4 {offsets = [0, 0], sizes = [8, 16], strides = [1, 1]} : vector<15x16xf32> to vector<8x16xf32>
    %c6_i32 = arith.constant 6 : i32
    %23 = vector.broadcast %c6_i32 : i32 to vector<1x16xi32>
    %24 = arith.cmpi eq, %21, %23 : vector<1x16xi32>
    %25 = vector.extract_strided_slice %4 {offsets = [1, 0], sizes = [8, 16], strides = [1, 1]} : vector<15x16xf32> to vector<8x16xf32>
    %26 = vector.shape_cast %24 : vector<1x16xi1> to vector<1x16xi1>
    %27 = vector.broadcast %26 : vector<1x16xi1> to vector<8x16xi1>
    %28 = arith.select %27, %25, %22 : vector<8x16xi1>, vector<8x16xf32>
    %c5_i32 = arith.constant 5 : i32
    %29 = vector.broadcast %c5_i32 : i32 to vector<1x16xi32>
    %30 = arith.cmpi eq, %21, %29 : vector<1x16xi32>
    %31 = vector.extract_strided_slice %4 {offsets = [2, 0], sizes = [8, 16], strides = [1, 1]} : vector<15x16xf32> to vector<8x16xf32>
    %32 = vector.shape_cast %30 : vector<1x16xi1> to vector<1x16xi1>
    %33 = vector.broadcast %32 : vector<1x16xi1> to vector<8x16xi1>
    %34 = arith.select %33, %31, %28 : vector<8x16xi1>, vector<8x16xf32>
    %c4_i32 = arith.constant 4 : i32
    %35 = vector.broadcast %c4_i32 : i32 to vector<1x16xi32>
    %36 = arith.cmpi eq, %21, %35 : vector<1x16xi32>
    %37 = vector.extract_strided_slice %4 {offsets = [3, 0], sizes = [8, 16], strides = [1, 1]} : vector<15x16xf32> to vector<8x16xf32>
    %38 = vector.shape_cast %36 : vector<1x16xi1> to vector<1x16xi1>
    %39 = vector.broadcast %38 : vector<1x16xi1> to vector<8x16xi1>
    %40 = arith.select %39, %37, %34 : vector<8x16xi1>, vector<8x16xf32>
    %c3_i32 = arith.constant 3 : i32
    %41 = vector.broadcast %c3_i32 : i32 to vector<1x16xi32>
    %42 = arith.cmpi eq, %21, %41 : vector<1x16xi32>
    %43 = vector.extract_strided_slice %4 {offsets = [4, 0], sizes = [8, 16], strides = [1, 1]} : vector<15x16xf32> to vector<8x16xf32>
    %44 = vector.shape_cast %42 : vector<1x16xi1> to vector<1x16xi1>
    %45 = vector.broadcast %44 : vector<1x16xi1> to vector<8x16xi1>
    %46 = arith.select %45, %43, %40 : vector<8x16xi1>, vector<8x16xf32>
    %c2_i32 = arith.constant 2 : i32
    %47 = vector.broadcast %c2_i32 : i32 to vector<1x16xi32>
    %48 = arith.cmpi eq, %21, %47 : vector<1x16xi32>
    %49 = vector.extract_strided_slice %4 {offsets = [5, 0], sizes = [8, 16], strides = [1, 1]} : vector<15x16xf32> to vector<8x16xf32>
    %50 = vector.shape_cast %48 : vector<1x16xi1> to vector<1x16xi1>
    %51 = vector.broadcast %50 : vector<1x16xi1> to vector<8x16xi1>
    %52 = arith.select %51, %49, %46 : vector<8x16xi1>, vector<8x16xf32>
    %c1_i32_9 = arith.constant 1 : i32
    %53 = vector.broadcast %c1_i32_9 : i32 to vector<1x16xi32>
    %54 = arith.cmpi eq, %21, %53 : vector<1x16xi32>
    %55 = vector.extract_strided_slice %4 {offsets = [6, 0], sizes = [8, 16], strides = [1, 1]} : vector<15x16xf32> to vector<8x16xf32>
    %56 = vector.shape_cast %54 : vector<1x16xi1> to vector<1x16xi1>
    %57 = vector.broadcast %56 : vector<1x16xi1> to vector<8x16xi1>
    %58 = arith.select %57, %55, %52 : vector<8x16xi1>, vector<8x16xf32>
    %c0_i32_10 = arith.constant 0 : i32
    %59 = vector.broadcast %c0_i32_10 : i32 to vector<1x16xi32>
    %60 = arith.cmpi eq, %21, %59 : vector<1x16xi32>
    %61 = vector.extract_strided_slice %4 {offsets = [7, 0], sizes = [8, 16], strides = [1, 1]} : vector<15x16xf32> to vector<8x16xf32>
    %62 = vector.shape_cast %60 : vector<1x16xi1> to vector<1x16xi1>
    %63 = vector.broadcast %62 : vector<1x16xi1> to vector<8x16xi1>
    %64 = arith.select %63, %61, %58 : vector<8x16xi1>, vector<8x16xf32>
    %c0_11 = arith.constant 0 : index
    %c0_12 = arith.constant 0 : index
    %c0_13 = arith.constant 0 : index
    %c0_14 = arith.constant 0 : index
    %65 = vector.load %arg5[%c0_11, %c0_12, %c0_13, %c0_14] : memref<1x1x8x16xf32, #tpu.memory_space<vmem>>, vector<1x1x8x16xf32>
    %66 = vector.shape_cast %65 : vector<1x1x8x16xf32> to vector<8x16xf32>
    %67 = vector.shape_cast %64 : vector<8x16xf32> to vector<1x1x8x16xf32>
    tpu.vector_store %arg5[%c0_11, %c0_12, %c0_13, %c0_14], %67 {strides = array<i32>} : memref<1x1x8x16xf32, #tpu.memory_space<vmem>>, vector<1x1x8x16xf32>,
    return
  }
  func.func @transform_0(%arg0: i32, %arg1: i32, %arg2: i32) -> (i32, i32, i32, i32) {
    %c0_i32 = arith.constant 0 : i32
    %c0_i32_0 = arith.constant 0 : i32
    return %arg1, %arg0, %arg2, %c0_i32 : i32, i32, i32, i32
  }
  func.func @transform_1(%arg0: i32, %arg1: i32, %arg2: i32) -> (i32, i32, i32) {
    %c0_i32 = arith.constant 0 : i32
    %c0_i32_0 = arith.constant 0 : i32
    %c0_i32_1 = arith.constant 0 : i32
    return %arg0, %c0_i32, %c0_i32_0 : i32, i32, i32
  }
  func.func @transform_2(%arg0: i32, %arg1: i32, %arg2: i32) -> (i32, i32, i32, i32) {
    %c0_i32 = arith.constant 0 : i32
    %c0_i32_0 = arith.constant 0 : i32
    return %arg1, %arg0, %c0_i32, %arg2 : i32, i32, i32, i32
  }
}

</mosaic_0001>

<bundles_post_ra>
// kernel: tpu_custom_call.1
= control target key start
LH: loop header
LB: loop body
LE: loop exit
PB: predicated region body
PF: predicated region fallthrough
CT: control target
= control target key end

     0   :  { %7 = vsyncpa [#allocation3], 0  ;;  %s959_s0 = inlined_call_operand.hbm [shape: f32[2,2,16,32], index: 0, kind: input, shape index: {}]   ;;  %s960_s1 = inlined_call_operand.vmem [shape: f32[2,15,32], index: 1, kind: input, shape index: {}]   ;;  %s961_s2 = inlined_call_operand.hbm [shape: f32[2,2,8,16], index: 2, kind: output, shape index: {}]  }
   0x1   :  { %9 = vsyncpa [#allocation3 + $0x1], 0 }
   0x2   :  { %10 = vsyncpa [#allocation4], 0 }
   0x3   :  { %12 = vsyncpa [#allocation4 + $0x1], 0  ;;  %s785_s9 = smov 0   ;;  %s787_s10 = smov 0  }
   0x4   :  { %s789_s11 = smov 0   ;;  %s791_s12 = smov 0  }
   0x5   :  { %s793_s13 = smov 0   ;;  %s795_s14 = smov 0  }
   0x6   :  { %s797_s15 = smov 0   ;;  %s799_s16 = smov 0  }
   0x7 LB: > { %s526_s17 = sadd.s32 4294967295, %s764_s16   ;;  %s527_s18 = sadd.s32 4294967294, %s764_s16   ;;  %s764_s16 = sphi %s799_s16, %s18_s16   ;;  %s760_s15 = sphi %s797_s15, %s976_s15   ;;  %s756_s14 = sphi %s795_s14, %s975_s14   ;;  %s752_s13 = sphi %s793_s13, %s974_s13   ;;  %s748_s12 = sphi %s791_s12, %s973_s12   ;;  %s744_s11 = sphi %s789_s11, %s972_s11   ;;  %s740_s10 = sphi %s787_s10, %s971_s10   ;;  %s736_s9 = sphi %s785_s9, %s970_s9  }
   0x8   : > { %s33_s19 = sadd.s32 1, %s756_s14  ;;  %s37_s20 = sadd.s32 1, %s760_s15 }
   0x9   : > { %p35_p0 = scmp.ge.s32.totalorder %s33_s19, 2  ;;  %s48_s21 = sadd.s32 1, %s744_s11 }
   0xa   : > { %p55_p1 = scmp.ne.s32.totalorder %s744_s11, %s740_s10  ;;  %p56_p2 = scmp.eq.s32.totalorder %s764_s16, 0 }
   0xb   : > { %s978_s19 = smov (%p35_p0, %s33_s19), 0  ;;  %s980_s20 = smov (!%p35_p0, %s37_s20), %s760_s15 }
   0xc   : > { %s41_s22 = ssub.s32 %s756_s14, %s978_s19  ;;  %p838_p3 = por %p56_p2, %p55_p1 }
   0xd   : > { %p39_p4 = scmp.ge.s32.totalorder %s980_s20, 2  ;;  %p61_p5 = scmp.ne.s32.totalorder %s740_s10, %s736_s9 }
   0xe   : > { %p62_p6 = scmp.eq.s32.totalorder %s526_s17, 0  ;;  %p115_p7 = scmp.eq.s32.totalorder %s526_s17, 3 }
   0xf   : > { %s982_s20 = smov (%p39_p4, %s980_s20), 0  ;;  %p121_p10 = scmp.eq.s32.totalorder %s527_s18, 3 }
  0x10   : > { %964 = sst [smem:[#allocation8_spill]] %s982_s20  ;;  %p846_p8 = por %p62_p6, %p61_p5 }
  0x11   : > { %p850_p9 = por %p115_p7, %p55_p1  ;;  %s42_s26 = ssub.s32 %s760_s15, %s982_s20 }
  0x12   : > { %s43_s27 = sor.u32 %s42_s26, %s41_s22  ;;  %p856_p12 = por %p121_p10, %p61_p5 }
  0x13   : > { %p46_p11 = scmp.eq.s32.totalorder %s43_s27, 0  ;;  %p572_p13 = scmp.lt.s32.totalorder %s764_s16, 4 }
  0x14   : > { %s141_s29 = sand.u32 1, %s744_s11   ;;  %s531_s4 = sshll.u32 %s760_s15, 1 }
  0x15   : > { %s863_s30 = scalar_select %p46_p11, %s744_s11, %s48_s21  }
  0x16   : > { %s530_s3 = sshll.u32 %s141_s29, 4  ;;  %s532_s5 = sshll.u32 %s756_s14, 2 }
  0x17   : > { %s145_s6 = scalar_lea.vmem [#allocation2], %s530_s3  ;;  %s153_s8 = sadd.s32 %s532_s5, %s531_s4 }
  0x18   : > { %s156_s7 = sshll.u32 %s145_s6, 4  ;;  %s533_s17 = sshll.u32 %s153_s8, 7  ;;  %s157_s7 = int_to_ptr.vmem [resolvable:$true] %s156_s7 }
  0x19   : > { %p869_p0 = pnand %p572_p13, %p838_p3  ;;  %s155_s27 = scalar_lea.hbm %s959_s0, %s533_s17 }
  0x1a   : > { %s142_s21 = scalar_lea.sflag [#allocation3], %s141_s29  ;;  %s653_s20 = scalar_lea.vmem %s157_s7, 256 }
  0x1b   : > { %p642_p1 = pneg %p869_p0  ;;  %p654_p2 = scmp.ne.s32.totalorder %s157_s7, %s653_s20 }
  0x1c   : > { %s766_s3 = smov [#allocation2]  }
  0x1d   : > { %p656_p4 = pnand %p654_p2, %p642_p1  ;;  %s658_s4 = sshll.u32 %s766_s3, 4  ;;  %s659_s4 = int_to_ptr.vmem [resolvable:$false] %s658_s4 }
  0x1e   : > { %s660_s23 = scalar_lea.vmem %s659_s4, 512  ;;  %p661_p3 = scmp.lt.s32.totalorder %s157_s7, %s659_s4 }
  0x1f   : > { %p657_p5 = pneg %p656_p4  ;;  %p662_p6 = scmp.lt.s32.totalorder %s660_s23, %s653_s20 }
  0x21   : > { %p663_p7 = por %p662_p6, %p661_p3 }
  0x23   : > { %p664_p10 = pnand %p663_p7, %p657_p5 }
  0x25   : > { %667 = shalt.err (!%p664_p10)
}
  0x26   : > { %s767_s5 = smov 128   ;;  %s768_s29 = smov 8  }
  0x27   : > { %567 = dma.hbm_to_vmem [thread:$0]  (!%p869_p0), %s155_s27, 256, %s157_s7, %s142_s21, %s767_s5, %s767_s5, %s768_s29  }
  0x28   : > { %p534_p11 = scmp.ge.s32.totalorder %s764_s16, 1  ;;  %p172_p13 = scmp.lt.s32.totalorder %s764_s16, 5 }
  0x2a   : > { %p173_p1 = pnand %p534_p11, %p172_p13 }
  0x2b   : > { %s883_s6 = sand.u32 (!%p173_p1), 1, %s740_s10  }
  0x2c   : > { %176 = sbr.rel (%p173_p1) target bundleno = 294 (0x126), region = 28  ;;  %s535_s20 = sshll.u32 (!%p173_p1), %s883_s6, 4 }
  0x2d   : > { %s179_s8 = scalar_lea.sflag (!%p173_p1), [#allocation3], %s883_s6  ;;  %s182_s17 = scalar_lea.vmem (!%p173_p1), [#allocation2], %s535_s20 }
  0x31   : > { %727 = dma.done.wait (%p846_p8), %s179_s8, 256  }
  0x32   : > { %729 = vsyncadd (%p846_p8), %s179_s8, 4294967040  ;;  %p209_p0 = scmp.lt.s32.totalorder %s752_s13, 1  ;;  %vm218_vm0 = vcmask 261120   ;;  %v215_v0 = vld [vmem:[%s182_s17 + $0x8] sm:$0xff]  ;;  %v214_v1 = vld [vmem:[%s182_s17] sm:$0xff]  ;;  %v306_v4 = vlaneseq  ;;  %vm333_vm3 = vcmask 1040384  }
  0x33   : > { %553 = vmatprep.subr.msk.mxu0 %vm218_vm0, %v215_v0  ;;  %s536_s24 = sshll.u32 %s883_s6, 3  ;;  %s544_s21 = sshll.u32 %s748_s12, 1  ;;  %vm401_vm9 = vcmask 130055   ;;  %vm403_vm10 = vcmask 129024  }
  0x34   : > { %s210_s7 = scalar_select %p209_p0, %s752_s13, 1  ;;  %554 = vmatpush3.xpose.msk.msra.mxu0 %vm218_vm0, %v215_v0  ;;  %v307_v5 = vand.u32 127, %v306_v4 }
  0x35   : > { %555 = vmatprep.subr.msk.mxu0 %vm218_vm0, %v214_v1  ;;  %s418_s3 = sadd.s32 %s752_s13, %s544_s21  ;;  %s207_s4 = scalar_lea.vmem [#allocation5], %s536_s24 }
  0x36   : > { %s548_s18 = sshll.u32 %s210_s7, 4  ;;  %v312_v6 = vand.u32 7, %v307_v5  ;;  %s545_s12 = sshll.u32 %s418_s3, 7 }
  0x37   : > { %s213_s27 = scalar_lea.vmem %s960_s1, %s548_s18  ;;  %s422_s23 = sshll.u32 %s207_s4, 4  ;;  %s423_s23 = int_to_ptr.vmem [resolvable:$true] %s422_s23 }
  0x38   : > { %v216_v2 = vld [vmem:[%s213_s27] sm:$0xff]  ;;  %556 = vmatpush3.xpose.msk.msra.mxu0 %vm218_vm0, %v214_v1  ;;  %v217_v3 = vld [vmem:[%s213_s27 + $0x8] sm:$0x7f]  ;;  %vm320_vm1 = vcmp.eq.s32.totalorder %v312_v6, 6  ;;  %vm328_vm2 = vcmp.eq.s32.totalorder %v312_v6, 5  ;;  %vm341_vm4 = vcmp.eq.s32.totalorder %v312_v6, 4  ;;  %s911_s20 = scalar_lea.hbm %s961_s2, %s545_s12 }
  0x39   : > { %557 = vmatprep.mubr.msk.f32.mxu0 %vm218_vm0, %v216_v2  ;;  %vm353_vm5 = vcmp.eq.s32.totalorder %v312_v6, 3  ;;  %vm365_vm6 = vcmp.eq.s32.totalorder %v312_v6, 2  ;;  %vm377_vm7 = vcmp.eq.s32.totalorder %v312_v6, 1  ;;  %vm389_vm8 = vcmp.eq.s32.totalorder %v312_v6, 0  ;;  %s406_s13 = scalar_lea.sflag [#allocation4], %s883_s6  ;;  %s668_s8 = scalar_lea.vmem %s423_s23, 128 }
  0x3a   : > { %p669_p8 = scmp.ne.s32.totalorder %s423_s23, %s668_s8  ;;  %s769_s17 = smov [#allocation5]  }
  0x3b   : > { %558 = vmatmul.mubr.msk.f32.vlgmr.msra.gmra.mxu0 %vm218_vm0, %v217_v3  ;;  %s672_s7 = sshll.u32 %s769_s17, 4  ;;  %s673_s7 = int_to_ptr.vmem [resolvable:$false] %s672_s7 }
  0x3c   : > { %p670_p2 = pnand %p669_p8, %p850_p9  ;;  %s674_s18 = scalar_lea.vmem %s673_s7, 256 }
  0x3d   : > { %p675_p5 = scmp.lt.s32.totalorder %s423_s23, %s673_s7  ;;  %p676_p3 = scmp.lt.s32.totalorder %s674_s18, %s668_s8 }
  0x3e   : > { %p671_p4 = pneg %p670_p2 }
  0x3f   : > { %p677_p6 = por %p676_p3, %p675_p5 }
  0x41   : > { %p678_p7 = pnand %p677_p6, %p671_p4 }
  0xfb   : > { %v559_v7 = vpop.f32.mrf.mxu0 }
  0xfd   : > { %v297_v8 = vpop.f32.mrf.mxu0 }
  0xfe   : > { %v324_v9 = vrot.slane %v297_v8, 7 }
 0x100   : > { %v326_v10 = vsel %vm320_vm1, %v297_v8, %v324_v9  ;;  %v327_v11 = vsel %vm320_vm1, %v559_v7, %v324_v9 }
 0x101   : > { %v334_v12 = vrot.slane %v326_v10, 7  ;;  %v335_v13 = vrot.slane %v327_v11, 7 }
 0x103   : > { %v336_v14 = vsel %vm333_vm3, %v334_v12, %v335_v13  ;;  %v339_v15 = vsel %vm328_vm2, %v297_v8, %v334_v12 }
 0x104   : > { %v340_v16 = vsel %vm328_vm2, %v559_v7, %v336_v14  ;;  %v346_v17 = vrot.slane %v339_v15, 7 }
 0x105   : > { %v347_v18 = vrot.slane %v340_v16, 7 }
 0x106   : > { %v351_v19 = vsel %vm341_vm4, %v297_v8, %v346_v17 }
 0x107   : > { %v348_v20 = vsel %vm333_vm3, %v346_v17, %v347_v18  ;;  %v358_v21 = vrot.slane %v351_v19, 7 }
 0x108   : > { %v352_v22 = vsel %vm341_vm4, %v559_v7, %v348_v20 }
 0x109   : > { %v359_v23 = vrot.slane %v352_v22, 7  ;;  %v363_v24 = vsel %vm353_vm5, %v297_v8, %v358_v21 }
 0x10a   : > { %v370_v25 = vrot.slane %v363_v24, 7 }
 0x10b   : > { %v360_v26 = vsel %vm333_vm3, %v358_v21, %v359_v23 }
 0x10c   : > { %v364_v27 = vsel %vm353_vm5, %v559_v7, %v360_v26  ;;  %v375_v28 = vsel %vm365_vm6, %v297_v8, %v370_v25 }
 0x10d   : > { %v371_v29 = vrot.slane %v364_v27, 7  ;;  %v382_v30 = vrot.slane %v375_v28, 7 }
 0x10f   : > { %v372_v31 = vsel %vm333_vm3, %v370_v25, %v371_v29  ;;  %v387_v32 = vsel %vm377_vm7, %v297_v8, %v382_v30 }
 0x110   : > { %v376_v33 = vsel %vm365_vm6, %v559_v7, %v372_v31  ;;  %v394_v34 = vrot.slane %v387_v32, 7 }
 0x111   : > { %v383_v35 = vrot.slane %v376_v33, 7 }
 0x112   : > { %v399_v36 = vsel %vm389_vm8, %v297_v8, %v394_v34 }
 0x113   : > { %v384_v37 = vsel %vm333_vm3, %v382_v30, %v383_v35  ;;  %402 = vst.msk [vmem:[%s207_s4 - $0x7] sm:$0x80] %vm401_vm9, %v399_v36 }
 0x114   : > { %v388_v38 = vsel %vm377_vm7, %v559_v7, %v384_v37 }
 0x115   : > { %v395_v39 = vrot.slane %v388_v38, 7 }
 0x117   : > { %v396_v40 = vsel %vm333_vm3, %v394_v34, %v395_v39 }
 0x118   : > { %v400_v41 = vsel %vm389_vm8, %v559_v7, %v396_v40 }
 0x119   : > { %404 = vst.msk [vmem:[%s207_s4 + $0x1] sm:$0x7f] %vm403_vm10, %v400_v41 }
 0x11a   : > { %681 = shalt.err (!%p678_p7)
}
 0x11b   : > { %s682_s22 = scalar_lea.hbm %s911_s20, 128  ;;  %s686_s27 = scalar_lea.hbm %s961_s2, 512 }
 0x11c   : > { %p683_p10 = scmp.ne.s32.totalorder %s911_s20, %s682_s22  ;;  %p687_p1 = scmp.lt.s32.totalorder %s911_s20, %s961_s2 }
 0x11d   : > { %p688_p0 = scmp.lt.s32.totalorder %s686_s27, %s682_s22 }
 0x11e   : > { %p684_p11 = pnand %p683_p10, %p850_p9 }
 0x11f   : > { %p689_p8 = por %p688_p0, %p687_p1 }
 0x120   : > { %p685_p13 = pneg %p684_p11 }
 0x122   : > { %p690_p2 = pnand %p689_p8, %p685_p13 }
 0x124   : > { %693 = shalt.err (!%p690_p2)
}
 0x125   : > { %562 = dma.vmem_to_hbm [thread:$0]  (%p850_p9), %s423_s23, 128, %s911_s20, %s406_s13  }
 0x126 PF: > { %p573_p4 = scmp.ge.s32.totalorder %s764_s16, 2  ;;  %s434_s3 = sand.u32 1, %s736_s9  }
 0x127   : > { %s435_s4 = scalar_lea.sflag [#allocation4], %s434_s3 }
 0x128   : > { %p569_p5 = pnand %p573_p4, %p856_p12 }
 0x12a   : > { %p570_p3 = pneg %p569_p5 }
 0x12c   : > { %731 = dma.done.wait (%p570_p3), %s435_s4, 128  }
 0x12d   : > { %733 = vsyncadd (%p570_p3), %s435_s4, 4294967168  ;;  %s18_s16 = sadd.s32 1, %s764_s16   ;;  %s969_s25 = sld [smem:[#allocation8_spill]] }
 0x12e   : > { %p15_p6 = scmp.ge.s32.totalorder %s18_s16, 6   ;;  %s970_s9 = smov %s740_s10 }
 0x12f   : > { %s971_s10 = smov %s744_s11  ;;  %s972_s11 = smov %s863_s30 }
 0x130   : > { %s973_s12 = smov %s756_s14  ;;  %s974_s13 = smov %s760_s15 }
 0x131   : > { %s975_s14 = smov %s978_s19  ;;  %17 = sbr.rel (!%p15_p6) target bundleno = 7 (0x7), region = 76 }
 0x133   : > { %s976_s15 = smov %s969_s25 }
 0x136   :  { %440 = vsyncpa [#allocation3], 1 }
 0x137   :  { %442 = vsyncpa [#allocation3 + $0x1], 1 }
 0x138   :  { %443 = vsyncpa [#allocation4], 1 }
 0x139   :  { %445 = vsyncpa [#allocation4 + $0x1], 1 }

</bundles_post_ra>
